<compile_context>
chip_gen: v5e
topology: v5e:2x2
jax: 0.10.0
libtpu: 0.0.40
codegen_flags: <defaults>
</compile_context>

<pallas_src>
import functools

import jax
import jax.numpy as jnp
from jax import lax
from jax.experimental import pallas as pl
from jax.experimental.pallas import tpu as pltpu

KSIZE = 7          # kernel_size (module asserts 3 or 7; we use 7)
PAD = 3            # padding for k=7
CONV_IN = 2        # conv input channels = [avg, max]

_BLOCK_BUDGET_BYTES = 2 * 1024 * 1024   # per double-buffered input tile


def _largest_divisor(n, cap, multiple=1):
    """Largest d | n with d <= cap and d % multiple == 0 (None if none)."""
    for d in range(min(n, cap), 0, -1):
        if n % d == 0 and d % multiple == 0:
            return d
    return None


def _choose_channel_block(C, HW):
    if C * HW * 4 <= _BLOCK_BUDGET_BYTES:
        return C                                    # whole C fits -> full dim
    cap = max(1, _BLOCK_BUDGET_BYTES // (HW * 4))
    d = _largest_divisor(C, cap, multiple=8)        # keep (8,128) block rule
    return d if d is not None else C


def _choose_batch_block(B, c_blk, HW):
    cap = max(1, _BLOCK_BUDGET_BYTES // (c_blk * HW * 4))
    d = _largest_divisor(B, cap)
    return d if d is not None else 1


# ---------------------------------------------------------------------------
# Stage 1: lane-dense channel mean / max reduction
# ---------------------------------------------------------------------------
def _reduce_kernel(x_ref, f_ref, sum_ref, max_ref, *, inv_c, n_chunks, ch):
    # x_ref   : (Bt, Tc, HW)  f32-castable, lane-dense input tile
    # f_ref   : (Bt, 2, HW)   output [avg, max], resident across the C grid axis
    # sum_ref : (Bt, 1, HW)   f32 VMEM running sum
    # max_ref : (Bt, 1, HW)   f32 VMEM running max
    c_idx = pl.program_id(1)
    bt, _, hw = sum_ref.shape

    def body(i, carry):
        s, m = carry
        start = pl.multiple_of(i * ch, ch)
        xc = x_ref[:, pl.ds(start, ch), :].astype(jnp.float32)   # (Bt, ch, HW)
        s = s + jnp.sum(xc, axis=1, keepdims=True)
        m = jnp.maximum(m, jnp.max(xc, axis=1, keepdims=True))
        return s, m

    init = (jnp.zeros((bt, 1, hw), jnp.float32),
            jnp.full((bt, 1, hw), -jnp.inf, jnp.float32))
    psum, pmax = lax.fori_loop(0, n_chunks, body, init,
                               unroll=bool(n_chunks <= 8))

    @pl.when(c_idx == 0)
    def _():
        sum_ref[...] = psum
        max_ref[...] = pmax

    @pl.when(c_idx > 0)
    def _():
        sum_ref[...] = sum_ref[...] + psum
        max_ref[...] = jnp.maximum(max_ref[...], pmax)

    @pl.when(c_idx == pl.num_programs(1) - 1)
    def _():
        f_ref[:, 0:1, :] = (sum_ref[...] * inv_c).astype(f_ref.dtype)
        f_ref[:, 1:2, :] = max_ref[...].astype(f_ref.dtype)


# ---------------------------------------------------------------------------
# Stage 2: 7x7 conv (hoisted lane-shift planes) + sigmoid
# ---------------------------------------------------------------------------
def _conv_kernel(w_ref, b_ref, f_ref, o_ref, planes_ref, *, H, W, out_ch):
    # w_ref      : (out_ch*2*7*7,) f32 SMEM (flattened OIHW conv weight)
    # b_ref      : (out_ch,)       f32 SMEM
    # f_ref      : (1, 2, H, W)    f32 VMEM  [avg, max] for one batch element
    # o_ref      : (1, out_ch, H, W)
    # planes_ref : (2*7, H+6, W)   f32 VMEM  lane-shifted, height-padded planes

    # Zero once per step (covers the 3-row halo and the shifted-out columns).
    planes_ref[...] = jnp.zeros_like(planes_ref)

    # Hoist the 14 lane (W-axis) shifts out of the (out_ch, kh) loops:
    # one shifted + height-padded plane per (input channel, kw).
    for c in range(CONV_IN):
        for kw in range(KSIZE):
            d = kw - PAD
            idx = c * KSIZE + kw
            if d == 0:
                planes_ref[idx, PAD:PAD + H, :] = f_ref[0, c]
            elif d > 0:
                planes_ref[idx, PAD:PAD + H, 0:W - d] = f_ref[0, c, :, d:W]
            else:
                planes_ref[idx, PAD:PAD + H, (-d):W] = f_ref[0, c, :, 0:W + d]

    # Accumulate: only cheap sublane-offset slices remain in the hot loop, and
    # each window load is shared across all output channels.
    accs = [jnp.full((H, W), b_ref[o], dtype=jnp.float32) for o in range(out_ch)]
    for c in range(CONV_IN):
        for kw in range(KSIZE):
            idx = c * KSIZE + kw
            for kh in range(KSIZE):
                window = planes_ref[idx, kh:kh + H, :]     # lane-aligned load
                for o in range(out_ch):
                    widx = ((o * CONV_IN + c) * KSIZE + kh) * KSIZE + kw
                    accs[o] = accs[o] + w_ref[widx] * window

    for o in range(out_ch):
        o_ref[0, o] = jax.nn.sigmoid(accs[o]).astype(o_ref.dtype)
    # TODO(synk): for out_ch >= ~8, an im2col + MXU matmul path would beat the
    # per-channel VPU FMA loop; out_ch=1 keeps the VPU path optimal.


# ---------------------------------------------------------------------------
# Wrapper
# ---------------------------------------------------------------------------
def spat_attn(x, weight, bias):
    """x: (B, C, H, W); weight: (out_ch, 2, 7, 7); bias: (out_ch,)."""
    B, C, H, W = x.shape
    out_ch = weight.shape[0]
    assert weight.shape == (out_ch, CONV_IN, KSIZE, KSIZE)
    assert H > PAD and W > PAD
    HW = H * W

    # ---- Stage 1: lane-dense channel reduction on the (B, C, H*W) view ----
    x2 = x.reshape(B, C, HW)
    c_blk = _choose_channel_block(C, HW)
    b_blk = _choose_batch_block(B, c_blk, HW)
    ch = _largest_divisor(c_blk, 8)          # in-kernel channel chunk
    n_chunks = c_blk // ch

    reduce_k = functools.partial(_reduce_kernel, inv_c=1.0 / C,
                                 n_chunks=n_chunks, ch=ch)
    feat = pl.pallas_call(
        reduce_k,
        out_shape=jax.ShapeDtypeStruct((B, CONV_IN, HW), jnp.float32),
        grid_spec=pltpu.PrefetchScalarGridSpec(
            num_scalar_prefetch=0,
            grid=(B // b_blk, C // c_blk),
            in_specs=[pl.BlockSpec((b_blk, c_blk, HW), lambda b, c: (b, c, 0))],
            out_specs=pl.BlockSpec((b_blk, CONV_IN, HW), lambda b, c: (b, 0, 0)),
            scratch_shapes=[pltpu.VMEM((b_blk, 1, HW), jnp.float32),
                            pltpu.VMEM((b_blk, 1, HW), jnp.float32)],
        ),
        compiler_params=pltpu.CompilerParams(
            dimension_semantics=("parallel", "arbitrary")),
    )(x2)
    feat4 = feat.reshape(B, CONV_IN, H, W)

    # ---- Stage 2: 7x7 conv + sigmoid on the small spatial feature map ----
    conv_k = functools.partial(_conv_kernel, H=H, W=W, out_ch=out_ch)
    out = pl.pallas_call(
        conv_k,
        out_shape=jax.ShapeDtypeStruct((B, out_ch, H, W), x.dtype),
        grid_spec=pltpu.PrefetchScalarGridSpec(
            num_scalar_prefetch=0,
            grid=(B,),
            in_specs=[
                pl.BlockSpec(memory_space=pltpu.MemorySpace.SMEM),   # flat weights
                pl.BlockSpec(memory_space=pltpu.MemorySpace.SMEM),   # bias
                pl.BlockSpec((1, CONV_IN, H, W), lambda b: (b, 0, 0, 0)),
            ],
            out_specs=pl.BlockSpec((1, out_ch, H, W), lambda b: (b, 0, 0, 0)),
            scratch_shapes=[
                pltpu.VMEM((CONV_IN * KSIZE, H + 2 * PAD, W), jnp.float32),
            ],
        ),
        compiler_params=pltpu.CompilerParams(
            dimension_semantics=("parallel",)),
    )(weight.reshape(-1).astype(jnp.float32), bias.astype(jnp.float32), feat4)
    return out


def _reference(x, weight, bias):
    avg = jnp.mean(x, axis=1, keepdims=True)
    mx = jnp.max(x, axis=1, keepdims=True)
    feat = jnp.concatenate([avg, mx], axis=1)
    out = jax.lax.conv_general_dilated(
        feat, weight, window_strides=(1, 1),
        padding=((PAD, PAD), (PAD, PAD)),
        dimension_numbers=("NCHW", "OIHW", "NCHW"))
    return jax.nn.sigmoid(out + bias[None, :, None, None])


if __name__ == "__main__":
    B, C, H, W = 2, 4, 16, 16   # x channel count C is free; conv in_ch is 2
    OUT_CH = 1                  # SpatAttn(in_ch=2, out_ch=1, kernel_size=7)

    key = jax.random.PRNGKey(0)
    kx, kw, kb = jax.random.split(key, 3)
    x = jax.random.normal(kx, (B, C, H, W), dtype=jnp.float32)
    weight = 0.1 * jax.random.normal(kw, (OUT_CH, CONV_IN, KSIZE, KSIZE),
                                     dtype=jnp.float32)
    bias = 0.1 * jax.random.normal(kb, (OUT_CH,), dtype=jnp.float32)

    out = jax.block_until_ready(spat_attn(x, weight, bias))
    ref = jax.block_until_ready(_reference(x, weight, bias))
    assert out.shape == (B, OUT_CH, H, W)
    assert jnp.allclose(out, ref, atol=1e-5, rtol=1e-5), "mismatch vs reference"

    print("KERNEL_OK")
</pallas_src>

<mosaic_0001>
module attributes {stable_mosaic.version = 11 : i64} {
  func.func @_reduce_kernel(%arg0: i32, %arg1: i32, %arg2: memref<2x4x256xf32, #tpu.memory_space<vmem>>, %arg3: memref<2x2x256xf32, #tpu.memory_space<vmem>>, %arg4: memref<2x1x256xf32, #tpu.memory_space<vmem>>, %arg5: memref<2x1x256xf32, #tpu.memory_space<vmem>>) attributes {dimension_semantics = [#tpu.dimension_semantics<parallel>, #tpu.dimension_semantics<arbitrary>], iteration_bounds = array<i64: 1, 1>, scalar_prefetch = 0 : i64, scratch_operands = 2 : i64, tpu.core_type = #tpu.core_type<tc>, window_params = [{transform_indices = @transform_0, window_bounds = array<i64: 2, 4, 256>}, {transform_indices = @transform_1, window_bounds = array<i64: 2, 2, 256>}]} {
    %cst = arith.constant 0.000000e+00 : f32
    %0 = vector.broadcast %cst : f32 to vector<2x1x256xf32>
    %cst_0 = arith.constant 0xFF800000 : f32
    %1 = vector.broadcast %cst_0 : f32 to vector<2x1x256xf32>
    %c0_i32 = arith.constant 0 : i32
    %c4_i32 = arith.constant 4 : i32
    %2 = arith.muli %c0_i32, %c4_i32 : i32
    %3 = tpu.assume_multiple %2, 4 : i32
    %c0 = arith.constant 0 : index
    %4 = arith.index_cast %3 : i32 to index
    %c0_1 = arith.constant 0 : index
    %5 = vector.load %arg2[%c0, %4, %c0_1] : memref<2x4x256xf32, #tpu.memory_space<vmem>>, vector<2x4x256xf32>
    %cst_2 = arith.constant dense<0.000000e+00> : vector<2x256xf32>
    %6 = vector.multi_reduction <add>, %5, %cst_2 [1] : vector<2x4x256xf32> to vector<2x256xf32>
    %7 = vector.shape_cast %6 : vector<2x256xf32> to vector<2x1x256xf32>
    %8 = arith.addf %0, %7 : vector<2x1x256xf32>
    %cst_3 = arith.constant dense<0xFF800000> : vector<2x256xf32>
    %9 = vector.multi_reduction <maximumf>, %5, %cst_3 [1] : vector<2x4x256xf32> to vector<2x256xf32>
    %10 = vector.shape_cast %9 : vector<2x256xf32> to vector<2x1x256xf32>
    %11 = arith.maximumf %1, %10 : vector<2x1x256xf32>
    %c1_i32 = arith.constant 1 : i32
    %c0_i32_4 = arith.constant 0 : i32
    %12 = arith.cmpi eq, %arg1, %c0_i32_4 : i32
    %13 = arith.extui %12 : i1 to i32
    %c0_i32_5 = arith.constant 0 : i32
    %14 = arith.cmpi ne, %13, %c0_i32_5 : i32
    scf.if %14 {
      %c0_10 = arith.constant 0 : index
      %c0_11 = arith.constant 0 : index
      %c0_12 = arith.constant 0 : index
      %21 = vector.load %arg4[%c0_10, %c0_11, %c0_12] : memref<2x1x256xf32, #tpu.memory_space<vmem>>, vector<2x1x256xf32>
      tpu.vector_store %arg4[%c0_10, %c0_11, %c0_12], %8 {strides = array<i32>} : memref<2x1x256xf32, #tpu.memory_space<vmem>>, vector<2x1x256xf32>,
      %c0_13 = arith.constant 0 : index
      %c0_14 = arith.constant 0 : index
      %c0_15 = arith.constant 0 : index
      %22 = vector.load %arg5[%c0_13, %c0_14, %c0_15] : memref<2x1x256xf32, #tpu.memory_space<vmem>>, vector<2x1x256xf32>
      tpu.vector_store %arg5[%c0_13, %c0_14, %c0_15], %11 {strides = array<i32>} : memref<2x1x256xf32, #tpu.memory_space<vmem>>, vector<2x1x256xf32>,
    } else {
    }
    %c0_i32_6 = arith.constant 0 : i32
    %15 = arith.cmpi sgt, %arg1, %c0_i32_6 : i32
    %16 = arith.extui %15 : i1 to i32
    %c0_i32_7 = arith.constant 0 : i32
    %17 = arith.cmpi ne, %16, %c0_i32_7 : i32
    scf.if %17 {
      %c0_10 = arith.constant 0 : index
      %c0_11 = arith.constant 0 : index
      %c0_12 = arith.constant 0 : index
      %21 = vector.load %arg4[%c0_10, %c0_11, %c0_12] : memref<2x1x256xf32, #tpu.memory_space<vmem>>, vector<2x1x256xf32>
      %22 = arith.addf %21, %8 : vector<2x1x256xf32>
      %c0_13 = arith.constant 0 : index
      %c0_14 = arith.constant 0 : index
      %c0_15 = arith.constant 0 : index
      %23 = vector.load %arg4[%c0_13, %c0_14, %c0_15] : memref<2x1x256xf32, #tpu.memory_space<vmem>>, vector<2x1x256xf32>
      tpu.vector_store %arg4[%c0_13, %c0_14, %c0_15], %22 {strides = array<i32>} : memref<2x1x256xf32, #tpu.memory_space<vmem>>, vector<2x1x256xf32>,
      %c0_16 = arith.constant 0 : index
      %c0_17 = arith.constant 0 : index
      %c0_18 = arith.constant 0 : index
      %24 = vector.load %arg5[%c0_16, %c0_17, %c0_18] : memref<2x1x256xf32, #tpu.memory_space<vmem>>, vector<2x1x256xf32>
      %25 = arith.maximumf %24, %11 : vector<2x1x256xf32>
      %c0_19 = arith.constant 0 : index
      %c0_20 = arith.constant 0 : index
      %c0_21 = arith.constant 0 : index
      %26 = vector.load %arg5[%c0_19, %c0_20, %c0_21] : memref<2x1x256xf32, #tpu.memory_space<vmem>>, vector<2x1x256xf32>
      tpu.vector_store %arg5[%c0_19, %c0_20, %c0_21], %25 {strides = array<i32>} : memref<2x1x256xf32, #tpu.memory_space<vmem>>, vector<2x1x256xf32>,
    } else {
    }
    %c0_i32_8 = arith.constant 0 : i32
    %18 = arith.cmpi eq, %arg1, %c0_i32_8 : i32
    %19 = arith.extui %18 : i1 to i32
    %c0_i32_9 = arith.constant 0 : i32
    %20 = arith.cmpi ne, %19, %c0_i32_9 : i32
    scf.if %20 {
      %c0_10 = arith.constant 0 : index
      %c0_11 = arith.constant 0 : index
      %c0_12 = arith.constant 0 : index
      %21 = vector.load %arg4[%c0_10, %c0_11, %c0_12] : memref<2x1x256xf32, #tpu.memory_space<vmem>>, vector<2x1x256xf32>
      %cst_13 = arith.constant 2.500000e-01 : f32
      %22 = vector.broadcast %cst_13 : f32 to vector<2x1x256xf32>
      %23 = arith.mulf %21, %22 : vector<2x1x256xf32>
      %c0_14 = arith.constant 0 : index
      %c0_15 = arith.constant 0 : index
      %c0_16 = arith.constant 0 : index
      %24 = vector.load %arg3[%c0_14, %c0_15, %c0_16] : memref<2x2x256xf32, #tpu.memory_space<vmem>>, vector<2x1x256xf32>
      tpu.vector_store %arg3[%c0_14, %c0_15, %c0_16], %23 {strides = array<i32>} : memref<2x2x256xf32, #tpu.memory_space<vmem>>, vector<2x1x256xf32>,
      %c0_17 = arith.constant 0 : index
      %c0_18 = arith.constant 0 : index
      %c0_19 = arith.constant 0 : index
      %25 = vector.load %arg5[%c0_17, %c0_18, %c0_19] : memref<2x1x256xf32, #tpu.memory_space<vmem>>, vector<2x1x256xf32>
      %c0_20 = arith.constant 0 : index
      %c1 = arith.constant 1 : index
      %c0_21 = arith.constant 0 : index
      %26 = vector.load %arg3[%c0_20, %c1, %c0_21] : memref<2x2x256xf32, #tpu.memory_space<vmem>>, vector<2x1x256xf32>
      tpu.vector_store %arg3[%c0_20, %c1, %c0_21], %25 {strides = array<i32>} : memref<2x2x256xf32, #tpu.memory_space<vmem>>, vector<2x1x256xf32>,
    } else {
    }
    return
  }
  func.func @transform_0(%arg0: i32, %arg1: i32) -> (i32, i32, i32) {
    %c0_i32 = arith.constant 0 : i32
    %c0_i32_0 = arith.constant 0 : i32
    return %arg0, %arg1, %c0_i32 : i32, i32, i32
  }
  func.func @transform_1(%arg0: i32, %arg1: i32) -> (i32, i32, i32) {
    %c0_i32 = arith.constant 0 : i32
    %c0_i32_0 = arith.constant 0 : i32
    %c0_i32_1 = arith.constant 0 : i32
    return %arg0, %c0_i32, %c0_i32_0 : i32, i32, i32
  }
}

</mosaic_0001>

<bundles_post_ra>
// kernel: tpu_custom_call.1
= control target key start
LH: loop header
LB: loop body
LE: loop exit
PB: predicated region body
PF: predicated region fallthrough
CT: control target
= control target key end

     0   :  { %6 = vsyncpa [#allocation5], 0  ;;  %s340_s0 = inlined_call_operand.hbm [shape: f32[2,4,256], index: 0, kind: input, shape index: {}]   ;;  %s341_s1 = inlined_call_operand.hbm [shape: f32[2,2,256], index: 1, kind: output, shape index: {}]  }
   0x1   :  { %7 = vsyncpa [#allocation6], 0  ;;  %s12_s8 = sshll.u32 %s340_s0, 4  ;;  %s286_s9 = smov [#allocation4]   ;;  %s13_s8 = int_to_ptr.hbm [resolvable:$true] %s12_s8 }
   0x2   :  { %s14_s10 = sshll.u32 %s286_s9, 4  ;;  %s287_s11 = smov 128   ;;  %s15_s10 = int_to_ptr.vmem [resolvable:$true] %s14_s10 }
   0x3   :  { %s288_s12 = smov 8  }
   0x4   :  { %20 = dma.hbm_to_vmem [thread:$0]  %s13_s8, 256, %s15_s10, [#allocation5], %s287_s11, %s287_s11, %s288_s12  }
   0x5   :  { %282 = dma.done.wait [#allocation5], 256  }
   0x6   :  { %283 = vsyncadd [#allocation5], 4294967040  ;;  %v28_v0 = vld [vmem:[#allocation4] sm:$0xff]  ;;  %v29_v1 = vld [vmem:[#allocation4 + $0x8] sm:$0xff]  ;;  %vm43_vm0 = vcmask 1043456   ;;  %v130_v23 = vlaneseq  ;;  %vm125_vm1 = vcmask 1040384  }
   0x7   :  { %32 = vst [vmem:[#allocation1] ss:$2 sm:$0xff] %v28_v0  ;;  %s289_s0 = smov [#allocation7]   ;;  %s215_s16 = sshll.u32 %s341_s1, 4  ;;  %s216_s16 = int_to_ptr.hbm [resolvable:$true] %s215_s16 }
   0x8   :  { %36 = vst [vmem:[#allocation1 + $0x10] ss:$2 sm:$0xff] %v29_v1  ;;  %vm311_vm2 = vcmp.lt.s32.totalorder %v130_v23, 256  ;;  %s213_s13 = sshll.u32 %s289_s0, 4  ;;  %s290_s17 = smov 64   ;;  %s214_s13 = int_to_ptr.vmem [resolvable:$true] %s213_s13 }
   0x9   :  { %s291_s18 = smov 4  }
   0xe   :  { %v33_v2 = vld.sshfl [vmem:[#allocation1] sm:$0xff pattern:$0x75316420]  ;;  %v34_v3 = vld.sshfl [vmem:[#allocation1 + $0x8] sm:$0xff pattern:$0x75316420] }
   0xf   :  { %v44_v4 = vsel %vm43_vm0, %v33_v2, 0.0  ;;  %v51_v5 = vsel %vm43_vm0, %v34_v3, 0.0  ;;  %76 = vst [vmem:[#allocation1] ss:$2 sm:$0xff] %v28_v0 }
  0x10   :  { %v45_v6 = vrot.slane %v44_v4, 4  ;;  %v52_v7 = vrot.slane %v51_v5, 4  ;;  %v37_v8 = vld.sshfl [vmem:[#allocation1 + $0x10] sm:$0xff pattern:$0x75316420] }
  0x11   :  { %v38_v9 = vld.sshfl [vmem:[#allocation1 + $0x18] sm:$0xff pattern:$0x75316420]  ;;  %v58_v10 = vsel %vm43_vm0, %v37_v8, 0.0 }
  0x12   :  { %v46_v11 = vadd.f32 %v45_v6, %v44_v4  ;;  %v53_v12 = vadd.f32 %v52_v7, %v51_v5  ;;  %v59_v13 = vrot.slane %v58_v10, 4  ;;  %v65_v14 = vsel %vm43_vm0, %v38_v9, 0.0  ;;  %80 = vst [vmem:[#allocation1 + $0x10] ss:$2 sm:$0xff] %v29_v1 }
  0x13   :  { %v66_v15 = vrot.slane %v65_v14, 4 }
  0x14   :  { %v47_v16 = vrot.slane %v46_v11, 2  ;;  %v54_v17 = vrot.slane %v53_v12, 2  ;;  %v60_v18 = vadd.f32 %v59_v13, %v58_v10 }
  0x15   :  { %v67_v19 = vadd.f32 %v66_v15, %v65_v14 }
  0x16   :  { %v61_v20 = vrot.slane %v60_v18, 2  ;;  %v48_v21 = vadd.f32 %v47_v16, %v46_v11  ;;  %v55_v22 = vadd.f32 %v54_v17, %v53_v12  ;;  %v77_v24 = vld.sshfl [vmem:[#allocation1] sm:$0xff pattern:$0x75316420] }
  0x17   :  { %v68_v25 = vrot.slane %v67_v19, 2  ;;  %v78_v26 = vld.sshfl [vmem:[#allocation1 + $0x8] sm:$0xff pattern:$0x75316420]  ;;  %v87_v27 = vsel %vm43_vm0, %v77_v24, -inf }
  0x18   :  { %v49_v28 = vrot.slane %v48_v21, 1  ;;  %v56_v29 = vrot.slane %v55_v22, 1  ;;  %v62_v30 = vadd.f32 %v61_v20, %v60_v18  ;;  %v88_v31 = vrot.slane %v87_v27, 4 }
  0x19   :  { %v69_v32 = vadd.f32 %v68_v25, %v67_v19  ;;  %v94_v33 = vsel %vm43_vm0, %v78_v26, -inf  ;;  %v81_v34 = vld.sshfl [vmem:[#allocation1 + $0x10] sm:$0xff pattern:$0x75316420] }
  0x1a   :  { %v57_v35 = vadd.f32 %v56_v29, %v55_v22  ;;  %v63_v37 = vrot.slane %v62_v30, 1  ;;  %v89_v38 = vmax.f32 %v87_v27, %v88_v31  ;;  %v82_v39 = vld.sshfl [vmem:[#allocation1 + $0x18] sm:$0xff pattern:$0x75316420]  ;;  %v95_v41 = vrot.slane %v94_v33, 4 }
  0x1b   :  { %v70_v40 = vrot.slane %v69_v32, 1  ;;  %v101_v42 = vsel %vm43_vm0, %v81_v34, -inf  ;;  %v108_v43 = vsel %vm43_vm0, %v82_v39, -inf  ;;  %v50_v44 = vadd.f32 %v49_v28, %v48_v21 }
  0x1c   :  { %v123_v45 = vrot.slane %v57_v35, 7  ;;  %v90_v46 = vrot.slane %v89_v38, 2  ;;  %v102_v47 = vrot.slane %v101_v42, 4  ;;  %v96_v49 = vmax.f32 %v94_v33, %v95_v41 }
  0x1d   :  { %v71_v48 = vadd.f32 %v70_v40, %v69_v32  ;;  %v109_v50 = vrot.slane %v108_v43, 4  ;;  %v64_v52 = vadd.f32 %v63_v37, %v62_v30 }
  0x1e   :  { %v126_v51 = vsel %vm125_vm1, %v50_v44, %v123_v45  ;;  %v103_v53 = vmax.f32 %v101_v42, %v102_v47  ;;  %v91_v55 = vmax.f32 %v89_v38, %v90_v46  ;;  %v97_v56 = vrot.slane %v96_v49, 2 }
  0x1f   :  { %134 = vst.msk [vmem:[#allocation2] sm:$0x3] %vm311_vm2, %v126_v51  ;;  %v124_v54 = vrot.slane %v71_v48, 7  ;;  %v110_v57 = vmax.f32 %v108_v43, %v109_v50 }
  0x20   :  { %v104_v58 = vrot.slane %v103_v53, 2  ;;  %v98_v60 = vmax.f32 %v96_v49, %v97_v56  ;;  %v92_v63 = vrot.slane %v91_v55, 1 }
  0x21   :  { %v127_v59 = vsel %vm125_vm1, %v64_v52, %v124_v54  ;;  %v111_v61 = vrot.slane %v110_v57, 2 }
  0x22   :  { %135 = vst.msk [vmem:[#allocation2 + $0x2] sm:$0x3] %vm311_vm2, %v127_v59  ;;  %v105_v62 = vmax.f32 %v103_v53, %v104_v58  ;;  %v99_v0 = vrot.slane %v98_v60, 1  ;;  %v93_v6 = vmax.f32 %v91_v55, %v92_v63 }
  0x23   :  { %v112_v1 = vmax.f32 %v110_v57, %v111_v61 }
  0x24   :  { %v100_v2 = vmax.f32 %v98_v60, %v99_v0  ;;  %v106_v3 = vrot.slane %v105_v62, 1 }
  0x25   :  { %v113_v4 = vrot.slane %v112_v1, 1 }
  0x26   :  { %v192_v5 = vld [vmem:[#allocation2] sm:$0x3]  ;;  %v140_v7 = vrot.slane %v100_v2, 7  ;;  %v107_v11 = vmax.f32 %v105_v62, %v106_v3 }
  0x27   :  { %v114_v8 = vmax.f32 %v112_v1, %v113_v4  ;;  %v194_v9 = vmul.f32 0.25, %v192_v5 }
  0x28   :  { %v142_v10 = vsel %vm125_vm1, %v93_v6, %v140_v7 }
  0x29   :  { %v141_v12 = vrot.slane %v114_v8, 7  ;;  %200 = vst.msk [vmem:[#allocation7] ss:$2 sm:$0x3] %vm311_vm2, %v194_v9  ;;  %v193_v13 = vld [vmem:[#allocation2 + $0x2] sm:$0x3] }
  0x2a   :  { %146 = vst.msk [vmem:[#allocation3] sm:$0x3] %vm311_vm2, %v142_v10  ;;  %v195_v14 = vmul.f32 0.25, %v193_v13 }
  0x2b   :  { %v143_v15 = vsel %vm125_vm1, %v107_v11, %v141_v12 }
  0x2c   :  { %147 = vst.msk [vmem:[#allocation3 + $0x2] sm:$0x3] %vm311_vm2, %v143_v15 }
  0x2d   :  { %202 = vst.msk [vmem:[#allocation7 + $0x4] ss:$2 sm:$0x3] %vm311_vm2, %v195_v14 }
  0x31   :  { %v203_v16 = vld [vmem:[#allocation3] sm:$0x3] }
  0x32   :  { %206 = vst.msk [vmem:[#allocation7 + $0x1] ss:$2 sm:$0x3] %vm311_vm2, %v203_v16 }
  0x33   :  { %v204_v17 = vld [vmem:[#allocation3 + $0x2] sm:$0x3] }
  0x34   :  { %208 = vst.msk [vmem:[#allocation7 + $0x5] ss:$2 sm:$0x3] %vm311_vm2, %v204_v17 }
  0x35   :  { %221 = dma.vmem_to_hbm [thread:$0]  %s214_s13, 128, %s216_s16, [#allocation6], %s290_s17, %s290_s17, %s291_s18  }
  0x36   :  { %284 = dma.done.wait [#allocation6], 128  }
  0x37   :  { %285 = vsyncadd [#allocation6], 4294967168 }
  0x38   :  { %226 = vsyncpa [#allocation5], 1 }
  0x39   :  { %227 = vsyncpa [#allocation6], 1 }

</bundles_post_ra>
